<compile_context>
chip_gen: v6e
topology: v6e:2x2x1
jax: 0.10.0
libtpu: 0.0.40
codegen_flags: <defaults>
</compile_context>

<pallas_src>
import functools

import jax
import jax.numpy as jnp
from jax.experimental import pallas as pl
from jax.experimental.pallas import tpu as pltpu


def _residual_kernel(x_ref, w_ref, shift_ref, out_ref, *, o):
    x = x_ref[...]                                       # (tile_r, i) f32
    # bf16 operands on the MXU, f32 accumulation. In-kernel f32->bf16 pack of
    # x is a cheap VPU op, hidden under the MXU/DMA.
    z = jnp.dot(x.astype(jnp.bfloat16), w_ref[...],
                preferred_element_type=jnp.float32)      # (tile_r, o) f32
    # BN scale pre-folded into the weight columns; only shift (bias+BN) left.
    h = jnp.maximum(z + shift_ref[...], 0.0)
    # torch.cat([h, x], dim=1) without materializing a concat temporary:
    # two disjoint slice stores straight from the existing vregs.
    out_ref[:, :o] = h.astype(out_ref.dtype)
    out_ref[:, o:] = x.astype(out_ref.dtype)


def init_residual_params(key, i, o):
    """Deterministic init mirroring nn.Linear(i, o) + nn.BatchNorm1d(o) shapes."""
    kw, kb, kg, kbeta, km, kv = jax.random.split(key, 6)
    bound = 1.0 / jnp.sqrt(jnp.float32(i))
    return dict(
        w=jax.random.uniform(kw, (i, o), jnp.float32, -bound, bound),  # (in, out)
        b=jax.random.uniform(kb, (o,), jnp.float32, -bound, bound),
        gamma=jax.random.uniform(kg, (o,), jnp.float32, 0.5, 1.5),
        beta=jax.random.uniform(kbeta, (o,), jnp.float32, -0.5, 0.5),
        running_mean=jax.random.normal(km, (o,), jnp.float32) * 0.1,
        running_var=jax.random.uniform(kv, (o,), jnp.float32, 0.5, 1.5),
    )


def fold_residual_params(params, *, eps=1e-5):
    """One-time per-layer fold (hoisted out of the per-call path).

    eval-mode BN:  bn(z) = (z - mean) * gamma * rsqrt(var + eps) + beta = z*s + t
    so             bn(x @ W + b) = x @ (W * s) + (b*s + t)
    The scale fold into W is done in f32, then cast once to bf16.
    """
    s = params["gamma"] * jax.lax.rsqrt(params["running_var"] + eps)
    t = params["beta"] - params["running_mean"] * s
    w_scaled = (params["w"] * s[None, :]).astype(jnp.bfloat16)       # (i, o) bf16
    shift = (params["b"] * s + t).reshape(1, -1).astype(jnp.float32)  # (1, o) f32
    return dict(w=w_scaled, shift=shift)


def _pick_tile_r(B, *, cap=512, min_tiles=2):
    """Row tile: big enough to amortize per-step overhead, small enough to give
    >= min_tiles grid steps (v7x 2-TC sharding + DMA/compute overlap)."""
    tile = min(cap, B)
    if pl.cdiv(B, tile) < min_tiles and B >= min_tiles * 8:
        tile = ((pl.cdiv(B, min_tiles) + 7) // 8) * 8
    return max(8, tile)


def residual_forward(x, folded):
    """Pallas forward. x: (B, i) float32, B % 8 == 0. Returns (B, o + i) f32."""
    B, i = x.shape
    o = folded["w"].shape[1]
    assert B % 8 == 0, "batch must be a multiple of 8 (TPU sublane)"

    tile_r = _pick_tile_r(B)
    grid = (pl.cdiv(B, tile_r),)

    # Explicit scoped-VMEM budget: double-buffered x / out tiles + resident
    # weight & shift, with margin (v5e's default scoped limit is only 16 MiB).
    need = 2 * (tile_r * i * 4 + tile_r * (o + i) * 4) + 2 * (i * o * 2 + o * 4)
    vmem_limit = int(max(16 * 2**20, min(int(1.5 * need), 64 * 2**20)))

    kernel = functools.partial(_residual_kernel, o=o)
    return pl.pallas_call(
        kernel,
        out_shape=jax.ShapeDtypeStruct((B, o + i), jnp.float32),
        grid=grid,
        in_specs=[
            pl.BlockSpec((tile_r, i), lambda r: (r, 0)),   # activations: row-tiled
            pl.BlockSpec((i, o), lambda r: (0, 0)),        # fused weight: VMEM-resident
            pl.BlockSpec((1, o), lambda r: (0, 0)),        # fused shift (bias + BN)
        ],
        out_specs=pl.BlockSpec((tile_r, o + i), lambda r: (r, 0)),
        compiler_params=pltpu.CompilerParams(
            dimension_semantics=("parallel",),
            vmem_limit_bytes=vmem_limit),
    )(x, folded["w"], folded["shift"])


def _reference_matched(x, params, eps=1e-5):
    """Pure-JAX reference matching the kernel numerics (bf16 operands, scale
    folded into W in f32 before the cast, f32 accumulation)."""
    s = params["gamma"] * jax.lax.rsqrt(params["running_var"] + eps)
    t = params["beta"] - params["running_mean"] * s
    w_scaled = (params["w"] * s[None, :]).astype(jnp.bfloat16)
    z = jnp.dot(x.astype(jnp.bfloat16), w_scaled,
                preferred_element_type=jnp.float32)
    h = jnp.maximum(z + (params["b"] * s + t), 0.0)
    return jnp.concatenate([h, x], axis=1)


def _reference_f32(x, params, eps=1e-5):
    """PyTorch-faithful f32 reference (fc -> eval-mode BN -> ReLU -> cat).
    The kernel's bf16 matmul operands are the only deviation (f32 accumulate),
    so this is checked at a looser tolerance."""
    z = x @ params["w"] + params["b"]
    z = (z - params["running_mean"]) * jax.lax.rsqrt(params["running_var"] + eps)
    z = z * params["gamma"] + params["beta"]
    h = jnp.maximum(z, 0.0)
    return jnp.concatenate([h, x], axis=1)


if __name__ == "__main__":
    # Small shapes consistent with a CTGAN generator Residual block.
    batch, i_dim, o_dim = 32, 16, 32

    key = jax.random.PRNGKey(0)
    key, kx = jax.random.split(key)
    x = jax.random.normal(kx, (batch, i_dim), jnp.float32)
    params = init_residual_params(key, i_dim, o_dim)

    folded = fold_residual_params(params)          # once per layer, not per call
    fwd = jax.jit(residual_forward)
    out = jax.block_until_ready(fwd(x, folded))

    assert out.shape == (batch, o_dim + i_dim)
    assert jnp.allclose(out, _reference_matched(x, params), atol=1e-4, rtol=1e-4), \
        "mismatch vs bf16-matched reference"
    assert jnp.allclose(out, _reference_f32(x, params), atol=3e-2, rtol=3e-2), \
        "mismatch vs f32 PyTorch-faithful reference"

    print("KERNEL_OK")
</pallas_src>

<mosaic_0001>
module attributes {stable_mosaic.version = 11 : i64} {
  func.func @_residual_kernel(%arg0: i32, %arg1: memref<16x16xf32, #tpu.memory_space<vmem>>, %arg2: memref<16x32xbf16, #tpu.memory_space<vmem>>, %arg3: memref<1x32xf32, #tpu.memory_space<vmem>>, %arg4: memref<16x48xf32, #tpu.memory_space<vmem>>) attributes {dimension_semantics = [#tpu.dimension_semantics<parallel>], iteration_bounds = array<i64: 2>, scalar_prefetch = 0 : i64, scratch_operands = 0 : i64, tpu.core_type = #tpu.core_type<tc>, window_params = [{transform_indices = @transform_0, window_bounds = array<i64: 16, 16>}, {pipeline_mode = #tpu.pipeline_mode<synchronous>, transform_indices = @transform_1, window_bounds = array<i64: 16, 32>}, {pipeline_mode = #tpu.pipeline_mode<synchronous>, transform_indices = @transform_2, window_bounds = array<i64: 1, 32>}, {transform_indices = @transform_3, window_bounds = array<i64: 16, 48>}]} {
    %c0 = arith.constant 0 : index
    %c0_0 = arith.constant 0 : index
    %0 = vector.load %arg1[%c0, %c0_0] : memref<16x16xf32, #tpu.memory_space<vmem>>, vector<16x16xf32>
    %1 = arith.truncf %0 : vector<16x16xf32> to vector<16x16xbf16>
    %c0_1 = arith.constant 0 : index
    %c0_2 = arith.constant 0 : index
    %2 = vector.load %arg2[%c0_1, %c0_2] : memref<16x32xbf16, #tpu.memory_space<vmem>>, vector<16x32xbf16>
    %cst = arith.constant dense<0.000000e+00> : vector<16x32xf32>
    %3 = tpu.matmul %1, %2, %cst {dimension_numbers = #tpu.dot_dimension_numbers<[1], [0], [0], [1], [0, 0, 1, 1], [], []>} : vector<16x16xbf16>, vector<16x32xbf16>, vector<16x32xf32> -> vector<16x32xf32>
    %c0_3 = arith.constant 0 : index
    %c0_4 = arith.constant 0 : index
    %4 = vector.load %arg3[%c0_3, %c0_4] : memref<1x32xf32, #tpu.memory_space<vmem>>, vector<1x32xf32>
    %5 = vector.broadcast %4 : vector<1x32xf32> to vector<16x32xf32>
    %6 = arith.addf %3, %5 : vector<16x32xf32>
    %cst_5 = arith.constant 0.000000e+00 : f32
    %7 = vector.broadcast %cst_5 : f32 to vector<16x32xf32>
    %8 = arith.maximumf %6, %7 : vector<16x32xf32>
    %c0_6 = arith.constant 0 : index
    %c0_7 = arith.constant 0 : index
    %9 = vector.load %arg4[%c0_6, %c0_7] : memref<16x48xf32, #tpu.memory_space<vmem>>, vector<16x32xf32>
    tpu.vector_store %arg4[%c0_6, %c0_7], %8 {strides = array<i32>} : memref<16x48xf32, #tpu.memory_space<vmem>>, vector<16x32xf32>,
    %c0_8 = arith.constant 0 : index
    %c32 = arith.constant 32 : index
    %10 = vector.load %arg4[%c0_8, %c32] : memref<16x48xf32, #tpu.memory_space<vmem>>, vector<16x16xf32>
    tpu.vector_store %arg4[%c0_8, %c32], %0 {strides = array<i32>} : memref<16x48xf32, #tpu.memory_space<vmem>>, vector<16x16xf32>,
    return
  }
  func.func @transform_0(%arg0: i32) -> (i32, i32) {
    %c0_i32 = arith.constant 0 : i32
    %c0_i32_0 = arith.constant 0 : i32
    return %arg0, %c0_i32 : i32, i32
  }
  func.func @transform_1(%arg0: i32) -> (i32, i32) {
    %c0_i32 = arith.constant 0 : i32
    %c0_i32_0 = arith.constant 0 : i32
    %c0_i32_1 = arith.constant 0 : i32
    return %c0_i32, %c0_i32_0 : i32, i32
  }
  func.func @transform_2(%arg0: i32) -> (i32, i32) {
    %c0_i32 = arith.constant 0 : i32
    %c0_i32_0 = arith.constant 0 : i32
    %c0_i32_1 = arith.constant 0 : i32
    return %c0_i32, %c0_i32_0 : i32, i32
  }
  func.func @transform_3(%arg0: i32) -> (i32, i32) {
    %c0_i32 = arith.constant 0 : i32
    %c0_i32_0 = arith.constant 0 : i32
    return %arg0, %c0_i32 : i32, i32
  }
}

</mosaic_0001>

<bundles_post_ra>
// kernel: residual_forward.1
= control target key start
LH: loop header
LB: loop body
LE: loop exit
PB: predicated region body
PF: predicated region fallthrough
CT: control target
= control target key end

     0   :  { %8 = vsyncpa [#allocation3], 0  ;;  %s594_s0 = inlined_call_operand.vmem [shape: f32[32,16], index: 0, kind: input, shape index: {}]   ;;  %s595_s1 = inlined_call_operand.vmem [shape: bf16[16,32], index: 1, kind: input, shape index: {}]   ;;  %s596_s2 = inlined_call_operand.vmem [shape: f32[1,32], index: 2, kind: input, shape index: {}]   ;;  %s597_s3 = inlined_call_operand.hbm [shape: f32[32,48], index: 3, kind: output, shape index: {}]  }
   0x1   :  { %10 = vsyncpa [#allocation3 + $0x1], 0  ;;  %s485_s12 = smov 0   ;;  %s487_s13 = smov 0  }
   0x2   :  { %s489_s14 = smov 0   ;;  %s491_s15 = smov 0  }
   0x3 LB: > { %s506_s16 = sadd.s32 4294967295, %s457_s15   ;;  %s328_s17 = sadd.s32 4294967294, %s457_s15   ;;  %s457_s15 = sphi %s491_s15, %s603_s15   ;;  %s453_s14 = sphi %s489_s14, %s602_s14   ;;  %s449_s13 = sphi %s487_s13, %s601_s13   ;;  %s445_s12 = sphi %s485_s12, %s600_s12  }
   0x4   : > { %s510_s18 = sadd.s32 1, %s457_s15   ;;  %s91_s19 = sadd.s32 1, %s453_s14 }
   0x5   : > { %s88_s20 = ssub.s32 %s457_s15, %s510_s18  ;;  %p101_p0 = scmp.ne.s32.totalorder %s453_s14, %s449_s13 }
   0x6   : > { %p89_p1 = scmp.eq.s32.totalorder %s88_s20, 0  ;;  %p102_p2 = scmp.eq.s32.totalorder %s506_s16, 1 }
   0x7   : > { %p107_p3 = scmp.ne.s32.totalorder %s449_s13, %s445_s12  ;;  %p108_p4 = scmp.eq.s32.totalorder %s328_s17, 1 }
   0x8   : > { %s521_s21 = scalar_select %p89_p1, %s453_s14, %s91_s19  }
   0x9   : > { %p523_p5 = por %p102_p2, %p101_p0  ;;  %p527_p6 = por %p108_p4, %p107_p3 }
   0xa   : > { %p331_p7 = scmp.ge.s32.totalorder %s457_s15, 1  ;;  %p141_p8 = scmp.lt.s32.totalorder %s457_s15, 3 }
   0xc   : > { %p142_p9 = pnand %p331_p7, %p141_p8 }
   0xd   : > { %s333_s26 = sshll.u32 (!%p142_p9), %s506_s16, 1  ;;  %s461_s4 = smov (!%p142_p9), 32  }
   0xe   : > { %145 = sbr.rel (%p142_p9) target bundleno = 241 (0xf1), region = 32  ;;  %p166_p10 = scmp.lt.s32.totalorder (!%p142_p9), %s333_s26, 3 }
   0xf   : > { %s162_s5 = sand.u32 (!%p142_p9), 1, %s449_s13   ;;  %s343_s9 = sshll.u32 (!%p142_p9), %s506_s16, 8 }
  0x10   : > { %s332_s8 = sshll.u32 (!%p142_p9), %s162_s5, 4  ;;  %s549_s20 = scalar_lea.hbm (!%p142_p9), %s597_s3, %s343_s9 }
  0x11   : > { %s164_s10 = scalar_lea.vmem (!%p142_p9), [#allocation2], %s332_s8  ;;  %s554_s16 = scalar_lea.sflag (!%p142_p9), [#allocation3], %s162_s5 }
  0x12   : > { %s266_s11 = sshll.u32 (!%p142_p9), %s164_s10, 4  ;;  %s462_s25 = smov (!%p142_p9), [#allocation2]   ;;  %s551_s11 = int_to_ptr.vmem [resolvable:$true] %s266_s11 }
  0x13   : > { %v396_v0 = vld [vmem:[%s595_s1] sm:$0xff]   ;;  %v459_v1 = vmov 0.0   ;;  %vm460_vm0 = vmmov 0   ;;  %s605_s26 = smov (!%p166_p10, %s333_s26), 3  ;;  %vm191_vm1 = vcmask 130048   ;;  %vm238_vm2 = vcmask 261120  }
  0x14   : > { %346 = vmatprep.subr.bf16.mxu0 %v459_v1  ;;  %348 = vmatprep.mubr.msk.bf16.mxu0 %vm460_vm0, %v459_v1  ;;  %s334_s27 = sshll.u32 %s605_s26, 3  ;;  %v335_v5 = vld [vmem:[%s596_s2] ss:$0 sm:$0xff]  ;;  %vm249_vm3 = vcmask 392448   ;;  %s397_s24 = scalar_lea.vmem %s551_s11, 256 }
  0x15   : > { %347 = vmatpush3.bf16.msra.mxu0 %v396_v0  ;;  %s169_s30 = scalar_lea.vmem %s594_s0, %s334_s27  ;;  %p398_p11 = scmp.ne.s32.totalorder %s551_s11, %s397_s24 }
  0x16   : > { %v173_v2 = vld [vmem:[%s169_s30] sm:$0xff]  ;;  %v174_v3 = vld [vmem:[%s169_s30 + $0x8] sm:$0xff]  ;;  %s401_s26 = sshll.u32 %s462_s25, 4  ;;  %s402_s26 = int_to_ptr.vmem [resolvable:$false] %s401_s26 }
  0x17   : > { %v175_v4 = vpack.c.bf16 %v174_v3, %v173_v2  ;;  %243 = vrot.lane.b32.xlu0 %v173_v2, %s461_s4  ;;  %p399_p12 = pnand %p398_p11, %p523_p5  ;;  %s403_s27 = scalar_lea.vmem %s402_s26, 512 }
  0x18   : > { %p404_p0 = scmp.lt.s32.totalorder %s551_s11, %s402_s26  ;;  %p405_p1 = scmp.lt.s32.totalorder %s403_s27, %s397_s24 }
  0x19   : > { %349 = vmatmul.mubr.msk.bf16.vlgmr.msra.gmra.mxu0 %vm191_vm1, %v175_v4  ;;  %p400_p13 = pneg %p399_p12 }
  0x1a   : > { %p406_p2 = por %p405_p1, %p404_p0 }
  0x1b   : > { %245 = vrot.lane.b32.xlu0 %v174_v3, %s461_s4 }
  0x1c   : > { %p407_p3 = pnand %p406_p2, %p400_p13 }
  0x89   : > { %v244_v8 = vpop.permute.xlu0 %243 }
  0x8d   : > { %v246_v15 = vpop.permute.xlu0 %245 }
  0xd9   : > { %v229_v6 = vpop.f32.mrf.mxu0 }
  0xda   : > { %v230_v7 = vadd.f32 %v335_v5, %v229_v6 }
  0xdb   : > { %v350_v9 = vpop.f32.mrf.mxu0 }
  0xdc   : > { %v236_v10 = vmax.f32 %v230_v7, 0.0 }
  0xdd   : > { %v232_v11 = vpop.f32.mrf.mxu0 }
  0xde   : > { %239 = vst.msk [vmem:[%s164_s10] sm:$0xff] %vm238_vm2, %v236_v10  ;;  %v233_v12 = vadd.f32 %v335_v5, %v232_v11 }
  0xdf   : > { %250 = vst.msk [vmem:[%s164_s10] sm:$0xff] %vm249_vm3, %v244_v8  ;;  %v351_v13 = vpop.f32.mrf.mxu0 }
  0xe0   : > { %v237_v14 = vmax.f32 %v233_v12, 0.0 }
  0xe2   : > { %240 = vst.msk [vmem:[%s164_s10 + $0x8] sm:$0xff] %vm238_vm2, %v237_v14 }
  0xe3   : > { %251 = vst.msk [vmem:[%s164_s10 + $0x8] sm:$0xff] %vm249_vm3, %v246_v15 }
  0xe4   : > { %410 = shalt.err (!%p407_p3)
}
  0xe5   : > { %s411_s28 = scalar_lea.hbm %s549_s20, 256  ;;  %s415_s4 = scalar_lea.hbm %s597_s3, 512 }
  0xe6   : > { %p412_p4 = scmp.ne.s32.totalorder %s549_s20, %s411_s28  ;;  %p416_p9 = scmp.lt.s32.totalorder %s549_s20, %s597_s3 }
  0xe7   : > { %p417_p10 = scmp.lt.s32.totalorder %s415_s4, %s411_s28 }
  0xe8   : > { %p413_p7 = pnand %p412_p4, %p523_p5 }
  0xe9   : > { %p418_p11 = por %p417_p10, %p416_p9 }
  0xea   : > { %p414_p8 = pneg %p413_p7 }
  0xec   : > { %p419_p12 = pnand %p418_p11, %p414_p8 }
  0xee   : > { %422 = shalt.err (!%p419_p12)
}
  0xef   : > { %s463_s7 = smov 128   ;;  %s464_s8 = smov 8  }
  0xf0   : > { %352 = dma.vmem_to_hbm [thread:$0]  (%p523_p5), %s551_s11, 256, %s549_s20, %s554_s16, %s463_s7, %s463_s7, %s464_s8  }
  0xf1 PF: > { %p358_p13 = scmp.ge.s32.totalorder %s457_s15, 2  ;;  %s281_s9 = sand.u32 1, %s445_s12  }
  0xf2   : > { %s282_s10 = scalar_lea.sflag [#allocation3], %s281_s9 }
  0xf3   : > { %p355_p0 = pnand %p358_p13, %p527_p6 }
  0xf5   : > { %p356_p1 = pneg %p355_p0 }
  0xf7   : > { %440 = dma.done.wait (%p356_p1), %s282_s10, 256  }
  0xf8   : > { %442 = vsyncadd (%p356_p1), %s282_s10, 4294967040  ;;  %p13_p2 = scmp.ge.s32.totalorder %s510_s18, 4   ;;  %s600_s12 = smov %s449_s13 }
  0xf9   : > { %s601_s13 = smov %s453_s14  ;;  %s602_s14 = smov %s521_s21 }
  0xfa   : > { %s603_s15 = smov %s510_s18  ;;  %15 = sbr.rel (!%p13_p2) target bundleno = 3 (0x3), region = 67 }
  0xff   :  { %287 = vsyncpa [#allocation3], 1 }
 0x100   :  { %289 = vsyncpa [#allocation3 + $0x1], 1 }

</bundles_post_ra>
